<compile_context>
chip_gen: v7x
topology: tpu7x:2x2x1
jax: 0.10.0
libtpu: 0.0.40
codegen_flags: <defaults>
</compile_context>

<pallas_src>
import jax
import jax.numpy as jnp
from jax.experimental import pallas as pl
from jax.experimental.pallas import tpu as pltpu

LANE = 128
_ROW_ALIGN = 32  # safe sublane multiple for f32/bf16/int8 blocks


def _zero_mask_kernel(x_ref, m_ref, o_ref):
    # Elementwise hot path: cast both operands to the (promoted) output dtype
    # on the VPU, one multiply per vreg.
    dt = o_ref.dtype
    o_ref[...] = x_ref[...].astype(dt) * m_ref[...].astype(dt)


def _zero_mask_scalar_kernel(x_ref, m_ref, o_ref):
    # Scalar mask stays resident in VMEM (constant index_map); broadcast in-kernel.
    dt = o_ref.dtype
    o_ref[...] = x_ref[...].astype(dt) * m_ref[0, 0].astype(dt)


def _target_stream_bytes() -> int:
    """Per-stream target block size in bytes, by TPU generation."""
    try:
        kind = jax.devices()[0].device_kind.lower()
    except Exception:  # pragma: no cover - CPU/interpret fallback
        kind = ""
    if "v5" in kind:
        return 2 << 20  # v5e: HBM slow enough that 2 MiB already hides step overhead
    return 4 << 20      # v6e / v7x: bigger blocks amortize the ~0.35 us per-step cost


def _round_up(n: int, m: int) -> int:
    return ((n + m - 1) // m) * m


def _pick_layout(aligned_total: int, bytes_per_elem: int):
    """Choose (W, rows, block_rows, grid) for a 128-lane-aligned flat size."""
    W = LANE
    for cand in (1024, 512, 256):
        if aligned_total % cand == 0:
            W = cand
            break
    rows = aligned_total // W

    # Keep block BYTES roughly constant regardless of W (covers x + mask + out).
    target_total = 3 * _target_stream_bytes()
    max_rows = max(_ROW_ALIGN,
                   (target_total // (W * bytes_per_elem)) // _ROW_ALIGN * _ROW_ALIGN)

    if rows > max_rows:
        block_rows = max_rows
    elif rows >= 2 * _ROW_ALIGN:
        # Guarantee >= 2 grid steps so ("parallel",) can use both v7x TensorCores.
        block_rows = _round_up(pl.cdiv(rows, 2), _ROW_ALIGN)
    else:
        block_rows = rows  # tiny input: whole slab as one (full-dim) block
    grid = (pl.cdiv(rows, block_rows),)
    return W, rows, block_rows, grid


def _vmem_limit_bytes(block_rows: int, W: int, bytes_per_elem: int) -> int:
    needed = 2 * block_rows * W * bytes_per_elem  # double-buffered, all streams
    return int(min(max(needed + (8 << 20), 32 << 20), 48 << 20))


def zero_mask(x: jax.Array, mask: jax.Array) -> jax.Array:
    """Computes x * mask (same semantics as torch ZeroMask.forward)."""
    out_dtype = jnp.promote_types(x.dtype, mask.dtype)

    if x.shape != mask.shape and mask.size != 1:
        # TODO(synk): keep structured broadcast masks (per-channel / per-row)
        # resident in VMEM with a constant index_map; for now a fused XLA
        # multiply (no jnp.broadcast_to into HBM, correct two-way broadcasting).
        return x.astype(out_dtype) * mask.astype(out_dtype)

    scalar_mask = mask.size == 1 and mask.shape != x.shape
    orig_shape = x.shape
    total = x.size

    if total == 0:
        return jnp.zeros(orig_shape, out_dtype)

    # Keep the mask narrow in HBM: bool -> int8 (1 B/elem). Other dtypes stream
    # natively; pre-cast reusable f32 masks to int8 *outside* the per-call path.
    mask_in = mask.astype(jnp.int8) if mask.dtype == jnp.bool_ else mask

    x_flat = jnp.reshape(x, (total,))
    aligned = (total // LANE) * LANE
    tail = total - aligned

    if aligned == 0:
        # Fewer than 128 elements: a fused XLA multiply beats any kernel launch.
        return x.astype(out_dtype) * mask.astype(out_dtype)

    out_itemsize = jnp.dtype(out_dtype).itemsize
    m_itemsize = 0 if scalar_mask else mask_in.dtype.itemsize
    bytes_per_elem = x.dtype.itemsize + m_itemsize + out_itemsize

    W, rows, block_rows, grid = _pick_layout(aligned, bytes_per_elem)
    x2d = jnp.reshape(x_flat[:aligned] if tail else x_flat, (rows, W))

    x_spec = pl.BlockSpec((block_rows, W), lambda i: (i, 0))
    out_spec = pl.BlockSpec((block_rows, W), lambda i: (i, 0))

    if scalar_mask:
        m2d = jnp.reshape(mask_in, (1, 1))
        m_spec = pl.BlockSpec((1, 1), lambda i: (0, 0))  # resident, no per-step DMA
        kernel = _zero_mask_scalar_kernel
    else:
        m_flat = jnp.reshape(mask_in, (total,))
        m2d = jnp.reshape(m_flat[:aligned] if tail else m_flat, (rows, W))
        m_spec = pl.BlockSpec((block_rows, W), lambda i: (i, 0))
        kernel = _zero_mask_kernel

    out2d = pl.pallas_call(
        kernel,
        out_shape=jax.ShapeDtypeStruct((rows, W), out_dtype),
        grid_spec=pltpu.PrefetchScalarGridSpec(
            num_scalar_prefetch=0,
            grid=grid,
            in_specs=[x_spec, m_spec],
            out_specs=out_spec,
        ),
        compiler_params=pltpu.CompilerParams(
            dimension_semantics=("parallel",),
            vmem_limit_bytes=_vmem_limit_bytes(block_rows, W, bytes_per_elem),
        ),
    )(x2d, m2d)

    out_flat = jnp.reshape(out2d, (aligned,))
    if tail:
        # <128-element tail: fused XLA multiply — no pad->kernel->slice round trip.
        x_tail = x_flat[aligned:]
        if scalar_mask:
            m_tail = jnp.reshape(mask_in, ())
        else:
            m_tail = jnp.reshape(mask_in, (total,))[aligned:]
        tail_out = x_tail.astype(out_dtype) * m_tail.astype(out_dtype)
        out_flat = jnp.concatenate([out_flat, tail_out])
    return jnp.reshape(out_flat, orig_shape)


if __name__ == "__main__":
    key = jax.random.PRNGKey(0)
    kx, km = jax.random.split(key)

    # NCHW input, small shapes (2*4*16*16 = 2048 elems -> one (2, 1024) slab).
    x = jax.random.normal(kx, (2, 4, 16, 16), dtype=jnp.float32)
    mask_f32 = (jax.random.uniform(km, (2, 4, 16, 16)) > 0.5).astype(jnp.float32)

    out = jax.block_until_ready(zero_mask(x, mask_f32))
    ref = x * mask_f32
    assert out.shape == ref.shape and out.dtype == ref.dtype
    assert jnp.allclose(out, ref), "mismatch vs float mask reference"

    # Narrow (bool -> int8) mask path.
    mask_bool = jax.random.uniform(km, (2, 4, 16, 16)) > 0.5
    out_b = jax.block_until_ready(zero_mask(x, mask_bool))
    assert jnp.allclose(out_b, x * mask_bool.astype(x.dtype)), "mismatch vs bool mask"

    # Scalar (broadcast) mask: mask stays resident in VMEM, never broadcast in HBM.
    mask_s = jnp.array(0.5, dtype=jnp.float32)
    out_s = jax.block_until_ready(zero_mask(x, mask_s))
    assert jnp.allclose(out_s, x * 0.5), "mismatch vs scalar mask"

    # Non-lane-aligned total (5*131 = 655): aligned prefix in-kernel, tail fused.
    x_odd = jax.random.normal(kx, (5, 131), dtype=jnp.float32)
    m_odd = (jax.random.uniform(km, (5, 131)) > 0.5).astype(jnp.float32)
    out_o = jax.block_until_ready(zero_mask(x_odd, m_odd))
    assert jnp.allclose(out_o, x_odd * m_odd), "mismatch vs ragged reference"

    print("KERNEL_OK")
</pallas_src>

<mosaic_0001>
module attributes {stable_mosaic.version = 11 : i64} {
  func.func @_zero_mask_kernel(%arg0: i32, %arg1: memref<2x1024xf32, #tpu.memory_space<vmem>>, %arg2: memref<2x1024xf32, #tpu.memory_space<vmem>>, %arg3: memref<2x1024xf32, #tpu.memory_space<vmem>>) attributes {dimension_semantics = [#tpu.dimension_semantics<parallel>], iteration_bounds = array<i64: 1>, scalar_prefetch = 0 : i64, scratch_operands = 0 : i64, tpu.core_type = #tpu.core_type<tc>, window_params = [{transform_indices = @transform_0, window_bounds = array<i64: 2, 1024>}, {transform_indices = @transform_1, window_bounds = array<i64: 2, 1024>}, {transform_indices = @transform_2, window_bounds = array<i64: 2, 1024>}]} {
    %c0 = arith.constant 0 : index
    %c0_0 = arith.constant 0 : index
    %0 = vector.load %arg1[%c0, %c0_0] : memref<2x1024xf32, #tpu.memory_space<vmem>>, vector<2x1024xf32>
    %c0_1 = arith.constant 0 : index
    %c0_2 = arith.constant 0 : index
    %1 = vector.load %arg2[%c0_1, %c0_2] : memref<2x1024xf32, #tpu.memory_space<vmem>>, vector<2x1024xf32>
    %2 = arith.mulf %0, %1 : vector<2x1024xf32>
    %c0_3 = arith.constant 0 : index
    %c0_4 = arith.constant 0 : index
    %3 = vector.load %arg3[%c0_3, %c0_4] : memref<2x1024xf32, #tpu.memory_space<vmem>>, vector<2x1024xf32>
    tpu.vector_store %arg3[%c0_3, %c0_4], %2 {strides = array<i32>} : memref<2x1024xf32, #tpu.memory_space<vmem>>, vector<2x1024xf32>,
    return
  }
  func.func @transform_0(%arg0: i32) -> (i32, i32) {
    %c0_i32 = arith.constant 0 : i32
    %c0_i32_0 = arith.constant 0 : i32
    return %arg0, %c0_i32 : i32, i32
  }
  func.func @transform_1(%arg0: i32) -> (i32, i32) {
    %c0_i32 = arith.constant 0 : i32
    %c0_i32_0 = arith.constant 0 : i32
    return %arg0, %c0_i32 : i32, i32
  }
  func.func @transform_2(%arg0: i32) -> (i32, i32) {
    %c0_i32 = arith.constant 0 : i32
    %c0_i32_0 = arith.constant 0 : i32
    return %arg0, %c0_i32 : i32, i32
  }
}

</mosaic_0001>

<bundles_post_ra>
// kernel: tpu_custom_call.1
= control target key start
LH: loop header
LB: loop body
LE: loop exit
PB: predicated region body
PF: predicated region fallthrough
CT: control target
= control target key end

     0   :  { %7 = vsyncpa [#allocation3], 0  ;;  %s189_s0 = inlined_call_operand.hbm [shape: f32[2,1024], index: 0, kind: input, shape index: {}]   ;;  %s190_s1 = inlined_call_operand.hbm [shape: f32[2,1024], index: 1, kind: input, shape index: {}]   ;;  %s191_s2 = inlined_call_operand.hbm [shape: f32[2,1024], index: 2, kind: output, shape index: {}]  }
   0x1   :  { %8 = vsyncpa [#allocation6], 0 }
   0x2   :  { %9 = vsyncpa [#allocation4], 0  ;;  %s135_s9 = smov [#allocation2]   ;;  %s136_s11 = smov [#allocation5]  }
   0x3   :  { %s16_s10 = sshll.u32 %s135_s9, 4  ;;  %s26_s12 = sshll.u32 %s136_s11, 4  ;;  %s17_s10 = int_to_ptr.vmem [resolvable:$true] %s16_s10  ;;  %s27_s12 = int_to_ptr.vmem [resolvable:$true] %s26_s12 }
   0x4   :  { %s63_s15 = scalar_lea.hbm %s189_s0, 256 }
   0x5   :  { %p64_p0 = scmp.ne.s32.totalorder %s189_s0, %s63_s15  ;;  %p67_p1 = scmp.lt.u32.totalorder %s63_s15, %s189_s0 }
   0x7   :  { %p69_p2 = pnand %p67_p1, %p64_p0 }
   0x9   :  { %72 = shalt.err (!%p69_p2)
}
   0xa   :  { %s73_s20 = scalar_lea.vmem %s17_s10, 256  ;;  %p78_p4 = scmp.lt.s32.totalorder %s17_s10, %s17_s10 }
   0xb   :  { %p74_p3 = scmp.ne.s32.totalorder %s17_s10, %s73_s20  ;;  %p79_p5 = scmp.lt.s32.totalorder %s73_s20, %s73_s20 }
   0xd   :  { %p80_p6 = por %p79_p5, %p78_p4 }
   0xf   :  { %p81_p7 = pnand %p80_p6, %p74_p3 }
  0x11   :  { %84 = shalt.err (!%p81_p7)
}
  0x12   :  { %19 = dma.hbm_to_vmem [thread:$0]  %s189_s0, 256, %s17_s10, [#allocation3]  }
  0x13   :  { %s85_s25 = scalar_lea.hbm %s190_s1, 256 }
  0x14   :  { %p86_p8 = scmp.ne.s32.totalorder %s190_s1, %s85_s25  ;;  %p89_p9 = scmp.lt.u32.totalorder %s85_s25, %s190_s1 }
  0x16   :  { %p91_p10 = pnand %p89_p9, %p86_p8 }
  0x18   :  { %94 = shalt.err (!%p91_p10)
}
  0x19   :  { %s95_s30 = scalar_lea.vmem %s27_s12, 256  ;;  %p100_p12 = scmp.lt.s32.totalorder %s27_s12, %s27_s12 }
  0x1a   :  { %p96_p11 = scmp.ne.s32.totalorder %s27_s12, %s95_s30  ;;  %p101_p13 = scmp.lt.s32.totalorder %s95_s30, %s95_s30 }
  0x1c   :  { %p102_p0 = por %p101_p13, %p100_p12 }
  0x1e   :  { %p103_p1 = pnand %p102_p0, %p96_p11 }
  0x20   :  { %106 = shalt.err (!%p103_p1)
}
  0x21   :  { %29 = dma.hbm_to_vmem [thread:$0]  %s190_s1, 256, %s27_s12, [#allocation6]  }
  0x22   :  { %129 = dma.done.wait [#allocation3], 256  }
  0x23   :  { %130 = vsyncadd [#allocation3], 4294967040 }
  0x24   :  { %131 = dma.done.wait [#allocation6], 256  }
  0x25   :  { %132 = vsyncadd [#allocation6], 4294967040  ;;  %s137_s4 = smov [#allocation7]   ;;  %v36_v0 = vld [vmem:[#allocation2] sm:$0xff]  ;;  %v38_v1 = vld [vmem:[#allocation5] sm:$0xff] }
  0x26   :  { %s50_s5 = sshll.u32 %s137_s4, 4  ;;  %v37_v2 = vld [vmem:[#allocation2 + $0x8] sm:$0xff]  ;;  %v40_v3 = vmul.f32 %v38_v1, %v36_v0  ;;  %v39_v4 = vld [vmem:[#allocation5 + $0x8] sm:$0xff]  ;;  %s51_s5 = int_to_ptr.vmem [resolvable:$true] %s50_s5 }
  0x27   :  { %v41_v5 = vmul.f32 %v39_v4, %v37_v2  ;;  %s107_s6 = scalar_lea.vmem %s51_s5, 256  ;;  %p112_p3 = scmp.lt.s32.totalorder %s51_s5, %s51_s5 }
  0x28   :  { %42 = vst [vmem:[#allocation7] sm:$0xff] %v40_v3  ;;  %p108_p2 = scmp.ne.s32.totalorder %s51_s5, %s107_s6  ;;  %p113_p4 = scmp.lt.s32.totalorder %s107_s6, %s107_s6 }
  0x29   :  { %43 = vst [vmem:[#allocation7 + $0x8] sm:$0xff] %v41_v5 }
  0x2a   :  { %p114_p5 = por %p113_p4, %p112_p3 }
  0x2c   :  { %p115_p6 = pnand %p114_p5, %p108_p2 }
  0x2e   :  { %118 = shalt.err (!%p115_p6)
}
  0x2f   :  { %s119_s8 = scalar_lea.hbm %s191_s2, 256 }
  0x30   :  { %p120_p7 = scmp.ne.s32.totalorder %s191_s2, %s119_s8  ;;  %p123_p8 = scmp.lt.u32.totalorder %s119_s8, %s191_s2 }
  0x32   :  { %p125_p9 = pnand %p123_p8, %p120_p7 }
  0x34   :  { %128 = shalt.err (!%p125_p9)
}
  0x35   :  { %53 = dma.vmem_to_hbm [thread:$0]  %s51_s5, 256, %s191_s2, [#allocation4]  }
  0x36   :  { %133 = dma.done.wait [#allocation4], 256  }
  0x37   :  { %134 = vsyncadd [#allocation4], 4294967040 }
  0x38   :  { %57 = vsyncpa [#allocation3], 1 }
  0x39   :  { %58 = vsyncpa [#allocation6], 1 }
  0x3a   :  { %59 = vsyncpa [#allocation4], 1 }

</bundles_post_ra>
